<compile_context>
chip_gen: v5e
topology: v5e:2x2
jax: 0.10.0
libtpu: 0.0.40
codegen_flags: <defaults>
</compile_context>

<pallas_src>
import functools

import jax
import jax.numpy as jnp
from jax.experimental import pallas as pl
from jax.experimental.pallas import tpu as pltpu


def mse_types_kernel(out_ref, tgt_ref, types_ref, res_ref, sum_acc, cnt_acc,
                     *, reduction):
    b = pl.program_id(0)

    @pl.when(b == 0)
    def _():
        sum_acc[...] = jnp.zeros_like(sum_acc)
        cnt_acc[...] = jnp.zeros_like(cnt_acc)

    o = out_ref[0]                                   # (T, HH) float32
    t = tgt_ref[0]                                   # (T, HH) float32
    ty = types_ref[0]                                # (1, HH) int32

    T, HH = o.shape
    # type ids 1..T down the sublane axis, compared against the label row.
    k = jax.lax.broadcasted_iota(jnp.int32, (T, HH), 0) + 1
    mask = (k == ty)                                 # (T, HH) bool

    d = o - t
    # (mask*o - mask*t)^2 == mask * d^2 for a 0/1 mask.
    sq = jnp.where(mask, d * d, jnp.float32(0.0))    # (T, HH)

    sum_acc[...] += jnp.sum(sq, axis=-1, keepdims=True)                      # (T, 1)
    cnt_acc[...] += jnp.sum(jnp.where(sq != 0, 1.0, 0.0), axis=-1,
                            keepdims=True)                                   # (T, 1)

    @pl.when(b == pl.num_programs(0) - 1)
    def _():
        mse_t = sum_acc[...] / (cnt_acc[...] + 1.0)  # (T, 1)
        if reduction == 'sum':
            r = jnp.sum(mse_t, axis=0, keepdims=True)        # (1, 1)
        else:  # 'mean'
            r = jnp.mean(mse_t, axis=0, keepdims=True)       # (1, 1)
        res_ref[...] = r


def mse_types_forward(output, target, types, reduction='sum'):
    """output/target: (B, T, H, H) float32; types: (B, H, H) integer-valued."""
    B, T, H, _ = output.shape
    HH = H * H

    out_f = output.reshape(B, T, HH).astype(jnp.float32)
    tgt_f = target.reshape(B, T, HH).astype(jnp.float32)
    types_f = types.reshape(B, 1, HH).astype(jnp.int32)

    res = pl.pallas_call(
        functools.partial(mse_types_kernel, reduction=reduction),
        out_shape=jax.ShapeDtypeStruct((1, 1), jnp.float32),
        grid=(B,),
        in_specs=[
            pl.BlockSpec((1, T, HH), lambda b: (b, 0, 0)),
            pl.BlockSpec((1, T, HH), lambda b: (b, 0, 0)),
            pl.BlockSpec((1, 1, HH), lambda b: (b, 0, 0)),
        ],
        out_specs=pl.BlockSpec((1, 1), lambda b: (0, 0)),
        scratch_shapes=[pltpu.VMEM((T, 1), jnp.float32),
                        pltpu.VMEM((T, 1), jnp.float32)],
        compiler_params=pltpu.CompilerParams(
            dimension_semantics=("arbitrary",)),   # batch axis is a reduction
    )(out_f, tgt_f, types_f)
    return res[0, 0]


def reference_forward(output, target, types, reduction='sum'):
    """Pure-JAX reference mirroring the PyTorch MSETypes module."""
    B, T = output.shape[0], output.shape[1]
    k = jnp.arange(1, T + 1, dtype=jnp.int32).reshape(1, T, 1, 1)
    mask = (k == types[:, None, :, :].astype(jnp.int32)).astype(output.dtype)
    o = mask * output
    t = mask * target
    mse = jnp.square(o - t)                                  # (B, T, H, H)
    mse = jnp.transpose(mse.reshape(B, T, -1), (1, 0, 2)).reshape(T, -1)
    s = jnp.sum(mse, axis=-1)
    c = jnp.sum(mse != 0, axis=-1).astype(s.dtype)
    mse_t = s / (c + 1.0)
    if reduction == 'sum':
        return jnp.sum(mse_t)
    return jnp.mean(mse_t)


if __name__ == "__main__":
    B, T, H = 2, 4, 16

    key = jax.random.PRNGKey(0)
    k_o, k_t, k_ty = jax.random.split(key, 3)

    output = jax.random.normal(k_o, (B, T, H, H), jnp.float32)
    target = jax.random.normal(k_t, (B, T, H, H), jnp.float32)
    # labels in [0, T]; 0 matches no type id (k starts at 1), exercising the mask
    types = jax.random.randint(k_ty, (B, H, H), 0, T + 1).astype(jnp.int32)

    res = mse_types_forward(output, target, types, reduction='sum')
    res = jax.block_until_ready(res)

    ref = reference_forward(output, target, types, reduction='sum')
    ref = jax.block_until_ready(ref)

    assert res.shape == ()
    assert jnp.allclose(res, ref, rtol=1e-3, atol=1e-3), (
        f"pallas={res} ref={ref}")

    print("KERNEL_OK")
</pallas_src>

<mosaic_0001>
module attributes {stable_mosaic.version = 11 : i64} {
  func.func @mse_types_kernel(%arg0: i32, %arg1: memref<1x4x256xf32, #tpu.memory_space<vmem>>, %arg2: memref<1x4x256xf32, #tpu.memory_space<vmem>>, %arg3: memref<1x1x256xi32, #tpu.memory_space<vmem>>, %arg4: memref<1x1xf32, #tpu.memory_space<vmem>>, %arg5: memref<4x1xf32, #tpu.memory_space<vmem>>, %arg6: memref<4x1xf32, #tpu.memory_space<vmem>>) attributes {dimension_semantics = [#tpu.dimension_semantics<arbitrary>], iteration_bounds = array<i64: 2>, scalar_prefetch = 0 : i64, scratch_operands = 2 : i64, tpu.core_type = #tpu.core_type<tc>, window_params = [{transform_indices = @transform_0, window_bounds = array<i64: 1, 4, 256>}, {transform_indices = @transform_1, window_bounds = array<i64: 1, 4, 256>}, {transform_indices = @transform_2, window_bounds = array<i64: 1, 1, 256>}, {pipeline_mode = #tpu.pipeline_mode<synchronous>, transform_indices = @transform_3, window_bounds = array<i64: 1, 1>}]} {
    %c0_i32 = arith.constant 0 : i32
    %0 = arith.cmpi eq, %arg0, %c0_i32 : i32
    %1 = arith.extui %0 : i1 to i32
    %c0_i32_0 = arith.constant 0 : i32
    %2 = arith.cmpi ne, %1, %c0_i32_0 : i32
    scf.if %2 {
      %cst_24 = arith.constant 0.000000e+00 : f32
      %36 = vector.broadcast %cst_24 : f32 to vector<4x1xf32>
      %c0_25 = arith.constant 0 : index
      %c0_26 = arith.constant 0 : index
      %37 = vector.load %arg5[%c0_25, %c0_26] : memref<4x1xf32, #tpu.memory_space<vmem>>, vector<4x1xf32>
      tpu.vector_store %arg5[%c0_25, %c0_26], %36 {strides = array<i32>} : memref<4x1xf32, #tpu.memory_space<vmem>>, vector<4x1xf32>,
      %cst_27 = arith.constant 0.000000e+00 : f32
      %38 = vector.broadcast %cst_27 : f32 to vector<4x1xf32>
      %c0_28 = arith.constant 0 : index
      %c0_29 = arith.constant 0 : index
      %39 = vector.load %arg6[%c0_28, %c0_29] : memref<4x1xf32, #tpu.memory_space<vmem>>, vector<4x1xf32>
      tpu.vector_store %arg6[%c0_28, %c0_29], %38 {strides = array<i32>} : memref<4x1xf32, #tpu.memory_space<vmem>>, vector<4x1xf32>,
    } else {
    }
    %c0 = arith.constant 0 : index
    %c0_1 = arith.constant 0 : index
    %c0_2 = arith.constant 0 : index
    %3 = vector.load %arg1[%c0, %c0_1, %c0_2] : memref<1x4x256xf32, #tpu.memory_space<vmem>>, vector<1x4x256xf32>
    %4 = vector.shape_cast %3 : vector<1x4x256xf32> to vector<4x256xf32>
    %c0_3 = arith.constant 0 : index
    %c0_4 = arith.constant 0 : index
    %c0_5 = arith.constant 0 : index
    %5 = vector.load %arg2[%c0_3, %c0_4, %c0_5] : memref<1x4x256xf32, #tpu.memory_space<vmem>>, vector<1x4x256xf32>
    %6 = vector.shape_cast %5 : vector<1x4x256xf32> to vector<4x256xf32>
    %c0_6 = arith.constant 0 : index
    %c0_7 = arith.constant 0 : index
    %c0_8 = arith.constant 0 : index
    %7 = vector.load %arg3[%c0_6, %c0_7, %c0_8] : memref<1x1x256xi32, #tpu.memory_space<vmem>>, vector<1x1x256xi32>
    %8 = vector.shape_cast %7 : vector<1x1x256xi32> to vector<1x256xi32>
    %9 = tpu.iota {dimensions = array<i32: 0>} : vector<4x256xi32>
    %c1_i32 = arith.constant 1 : i32
    %10 = vector.broadcast %c1_i32 : i32 to vector<4x256xi32>
    %11 = arith.addi %9, %10 : vector<4x256xi32>
    %12 = vector.broadcast %8 : vector<1x256xi32> to vector<4x256xi32>
    %13 = arith.cmpi eq, %11, %12 : vector<4x256xi32>
    %14 = arith.subf %4, %6 : vector<4x256xf32>
    %15 = arith.mulf %14, %14 : vector<4x256xf32>
    %cst = arith.constant 0.000000e+00 : f32
    %16 = vector.broadcast %cst : f32 to vector<4x256xf32>
    %17 = arith.select %13, %15, %16 : vector<4x256xi1>, vector<4x256xf32>
    %c0_9 = arith.constant 0 : index
    %c0_10 = arith.constant 0 : index
    %18 = vector.load %arg5[%c0_9, %c0_10] : memref<4x1xf32, #tpu.memory_space<vmem>>, vector<4x1xf32>
    %cst_11 = arith.constant dense<0.000000e+00> : vector<4xf32>
    %19 = vector.multi_reduction <add>, %17, %cst_11 [1] : vector<4x256xf32> to vector<4xf32>
    %20 = vector.shape_cast %19 : vector<4xf32> to vector<4x1xf32>
    %21 = arith.addf %18, %20 : vector<4x1xf32>
    %c0_12 = arith.constant 0 : index
    %c0_13 = arith.constant 0 : index
    %22 = vector.load %arg5[%c0_12, %c0_13] : memref<4x1xf32, #tpu.memory_space<vmem>>, vector<4x1xf32>
    tpu.vector_store %arg5[%c0_12, %c0_13], %21 {strides = array<i32>} : memref<4x1xf32, #tpu.memory_space<vmem>>, vector<4x1xf32>,
    %c0_14 = arith.constant 0 : index
    %c0_15 = arith.constant 0 : index
    %23 = vector.load %arg6[%c0_14, %c0_15] : memref<4x1xf32, #tpu.memory_space<vmem>>, vector<4x1xf32>
    %cst_16 = arith.constant 0.000000e+00 : f32
    %24 = vector.broadcast %cst_16 : f32 to vector<4x256xf32>
    %25 = arith.cmpf one, %17, %24 : vector<4x256xf32>
    %cst_17 = arith.constant 1.000000e+00 : f32
    %cst_18 = arith.constant 0.000000e+00 : f32
    %26 = vector.broadcast %cst_17 : f32 to vector<4x256xf32>
    %27 = vector.broadcast %cst_18 : f32 to vector<4x256xf32>
    %28 = arith.select %25, %26, %27 : vector<4x256xi1>, vector<4x256xf32>
    %cst_19 = arith.constant dense<0.000000e+00> : vector<4xf32>
    %29 = vector.multi_reduction <add>, %28, %cst_19 [1] : vector<4x256xf32> to vector<4xf32>
    %30 = vector.shape_cast %29 : vector<4xf32> to vector<4x1xf32>
    %31 = arith.addf %23, %30 : vector<4x1xf32>
    %c0_20 = arith.constant 0 : index
    %c0_21 = arith.constant 0 : index
    %32 = vector.load %arg6[%c0_20, %c0_21] : memref<4x1xf32, #tpu.memory_space<vmem>>, vector<4x1xf32>
    tpu.vector_store %arg6[%c0_20, %c0_21], %31 {strides = array<i32>} : memref<4x1xf32, #tpu.memory_space<vmem>>, vector<4x1xf32>,
    %c1_i32_22 = arith.constant 1 : i32
    %33 = arith.cmpi eq, %arg0, %c1_i32_22 : i32
    %34 = arith.extui %33 : i1 to i32
    %c0_i32_23 = arith.constant 0 : i32
    %35 = arith.cmpi ne, %34, %c0_i32_23 : i32
    scf.if %35 {
      %c0_24 = arith.constant 0 : index
      %c0_25 = arith.constant 0 : index
      %36 = vector.load %arg5[%c0_24, %c0_25] : memref<4x1xf32, #tpu.memory_space<vmem>>, vector<4x1xf32>
      %c0_26 = arith.constant 0 : index
      %c0_27 = arith.constant 0 : index
      %37 = vector.load %arg6[%c0_26, %c0_27] : memref<4x1xf32, #tpu.memory_space<vmem>>, vector<4x1xf32>
      %cst_28 = arith.constant 1.000000e+00 : f32
      %38 = vector.broadcast %cst_28 : f32 to vector<4x1xf32>
      %39 = arith.addf %37, %38 : vector<4x1xf32>
      %40 = arith.divf %36, %39 : vector<4x1xf32>
      %cst_29 = arith.constant dense<0.000000e+00> : vector<1xf32>
      %41 = vector.multi_reduction <add>, %40, %cst_29 [0] : vector<4x1xf32> to vector<1xf32>
      %42 = vector.shape_cast %41 : vector<1xf32> to vector<1x1xf32>
      %c0_30 = arith.constant 0 : index
      %c0_31 = arith.constant 0 : index
      %43 = vector.load %arg4[%c0_30, %c0_31] : memref<1x1xf32, #tpu.memory_space<vmem>>, vector<1x1xf32>
      tpu.vector_store %arg4[%c0_30, %c0_31], %42 {strides = array<i32>} : memref<1x1xf32, #tpu.memory_space<vmem>>, vector<1x1xf32>,
    } else {
    }
    return
  }
  func.func @transform_0(%arg0: i32) -> (i32, i32, i32) {
    %c0_i32 = arith.constant 0 : i32
    %c0_i32_0 = arith.constant 0 : i32
    %c0_i32_1 = arith.constant 0 : i32
    return %arg0, %c0_i32, %c0_i32_0 : i32, i32, i32
  }
  func.func @transform_1(%arg0: i32) -> (i32, i32, i32) {
    %c0_i32 = arith.constant 0 : i32
    %c0_i32_0 = arith.constant 0 : i32
    %c0_i32_1 = arith.constant 0 : i32
    return %arg0, %c0_i32, %c0_i32_0 : i32, i32, i32
  }
  func.func @transform_2(%arg0: i32) -> (i32, i32, i32) {
    %c0_i32 = arith.constant 0 : i32
    %c0_i32_0 = arith.constant 0 : i32
    %c0_i32_1 = arith.constant 0 : i32
    return %arg0, %c0_i32, %c0_i32_0 : i32, i32, i32
  }
  func.func @transform_3(%arg0: i32) -> (i32, i32) {
    %c0_i32 = arith.constant 0 : i32
    %c0_i32_0 = arith.constant 0 : i32
    %c0_i32_1 = arith.constant 0 : i32
    return %c0_i32, %c0_i32_0 : i32, i32
  }
}

</mosaic_0001>

<bundles_post_ra>
// kernel: tpu_custom_call.1
= control target key start
LH: loop header
LB: loop body
LE: loop exit
PB: predicated region body
PF: predicated region fallthrough
CT: control target
= control target key end

     0   :  { %8 = vsyncpa [#allocation5], 0  ;;  %s848_s0 = inlined_call_operand.hbm [shape: f32[2,4,256], index: 0, kind: input, shape index: {}]   ;;  %s849_s1 = inlined_call_operand.hbm [shape: f32[2,4,256], index: 1, kind: input, shape index: {}]   ;;  %s850_s2 = inlined_call_operand.hbm [shape: s32[2,1,256], index: 2, kind: input, shape index: {}]   ;;  %s851_s3 = inlined_call_operand.hbm [shape: f32[1,1], index: 3, kind: output, shape index: {}]  }
   0x1   :  { %10 = vsyncpa [#allocation5 + $0x1], 0 }
   0x2   :  { %11 = vsyncpa [#allocation8], 0 }
   0x3   :  { %13 = vsyncpa [#allocation8 + $0x1], 0 }
   0x4   :  { %14 = vsyncpa [#allocation6], 0  ;;  %s703_s12 = smov 0   ;;  %s705_s13 = smov 0  }
   0x5   :  { %s707_s14 = smov 0   ;;  %s709_s15 = smov 0  }
   0x6 LB: > { %s722_s16 = sadd.s32 4294967295, %s678_s15   ;;  %s725_s17 = sadd.s32 1, %s678_s15   ;;  %s678_s15 = sphi %s709_s15, %s858_s15   ;;  %s674_s14 = sphi %s707_s14, %s857_s14   ;;  %s670_s13 = sphi %s705_s13, %s856_s13   ;;  %s666_s12 = sphi %s703_s12, %s855_s12  }
   0x7   : > { %s24_s18 = ssub.s32 %s678_s15, %s725_s17  ;;  %s27_s19 = sadd.s32 1, %s674_s14 }
   0x8   : > { %p25_p0 = scmp.eq.s32.totalorder %s24_s18, 0  ;;  %p34_p1 = scmp.ne.s32.totalorder %s674_s14, %s670_s13 }
   0x9   : > { %p35_p2 = scmp.eq.s32.totalorder %s678_s15, 0  ;;  %p40_p3 = scmp.ne.s32.totalorder %s670_s13, %s666_s12 }
   0xa   : > { %s735_s20 = scalar_select %p25_p0, %s674_s14, %s27_s19  }
   0xb   : > { %p36_p4 = por %p35_p2, %p34_p1  ;;  %p41_p5 = scmp.eq.s32.totalorder %s722_s16, 0 }
   0xc   : > { %p478_p6 = scmp.lt.s32.totalorder %s678_s15, 2  ;;  %s744_s22 = sand.u32 1, %s674_s14  }
   0xd   : > { %p739_p7 = por %p41_p5, %p40_p3  ;;  %s438_s23 = sshll.u32 %s744_s22, 3 }
   0xe   : > { %s456_s24 = sshll.u32 %s678_s15, 3  ;;  %p748_p8 = pnand %p478_p6, %p36_p4 }
   0xf   : > { %s157_s26 = sand.u32 1, %s678_s15   ;;  %s166_s29 = scalar_lea.hbm %s849_s1, %s456_s24 }
  0x10   : > { %s168_s30 = sshll.u32 %s166_s29, 4  ;;  %s161_s4 = scalar_lea.vmem [#allocation7], %s438_s23  ;;  %s169_s30 = int_to_ptr.hbm [resolvable:$true] %s168_s30 }
  0x11   : > { %s170_s5 = sshll.u32 %s161_s4, 4  ;;  %s758_s6 = scalar_lea.sflag [#allocation8], %s157_s26  ;;  %s171_s5 = int_to_ptr.vmem [resolvable:$true] %s170_s5 }
  0x12   : > { %s518_s7 = sshra.s32 %s169_s30, 4  ;;  %p522_p10 = pneg %p748_p8  ;;  %s519_s7 = int_to_ptr.hbm [resolvable:$true] %s518_s7 }
  0x13   : > { %s520_s8 = scalar_lea.hbm %s519_s7, 8  ;;  %s525_s11 = scalar_lea.hbm %s849_s1, 16 }
  0x14   : > { %p521_p9 = scmp.ne.s32.totalorder %s519_s7, %s520_s8  ;;  %p526_p13 = scmp.lt.s32.totalorder %s519_s7, %s849_s1 }
  0x15   : > { %p527_p0 = scmp.lt.s32.totalorder %s525_s11, %s520_s8 }
  0x16   : > { %p523_p11 = pnand %p522_p10, %p521_p9 }
  0x17   : > { %p528_p1 = por %p527_p0, %p526_p13 }
  0x18   : > { %p524_p12 = pneg %p523_p11 }
  0x1a   : > { %p529_p2 = pnand %p528_p1, %p524_p12 }
  0x1c   : > { %532 = shalt.err (!%p529_p2)
}
  0x1d   : > { %474 = dma.hbm_to_vmem [thread:$0]  (!%p748_p8), %s169_s30, 128, %s171_s5, %s758_s6  }
  0x1e   : > { %p446_p3 = scmp.ge.s32.totalorder %s678_s15, 1  ;;  %p194_p4 = scmp.lt.s32.totalorder %s678_s15, 3 }
  0x1f   : > { %s146_s28 = scalar_lea.hbm %s848_s0, %s456_s24  ;;  %s141_s4 = scalar_lea.vmem [#allocation4], %s438_s23 }
  0x20   : > { %p776_p5 = pnand %p446_p3, %p194_p4  ;;  %s148_s29 = sshll.u32 %s146_s28, 4  ;;  %s149_s29 = int_to_ptr.hbm [resolvable:$true] %s148_s29 }
  0x21   : > { %s150_s7 = sshll.u32 %s141_s4, 4  ;;  %s138_s8 = scalar_lea.sflag [#allocation5], %s744_s22  ;;  %s151_s7 = int_to_ptr.vmem [resolvable:$true] %s150_s7 }
  0x22   : > { %s548_s9 = sshra.s32 %s149_s29, 4  ;;  %s555_s11 = scalar_lea.hbm %s848_s0, 16  ;;  %s549_s9 = int_to_ptr.hbm [resolvable:$true] %s548_s9 }
  0x23   : > { %s550_s30 = scalar_lea.hbm %s549_s9, 8  ;;  %p556_p12 = scmp.lt.s32.totalorder %s549_s9, %s848_s0 }
  0x24   : > { %p551_p6 = scmp.ne.s32.totalorder %s549_s9, %s550_s30  ;;  %p557_p13 = scmp.lt.s32.totalorder %s555_s11, %s550_s30 }
  0x26   : > { %p553_p9 = pnand %p551_p6, %p522_p10  ;;  %p558_p0 = por %p557_p13, %p556_p12 }
  0x28   : > { %p554_p11 = pneg %p553_p9 }
  0x2a   : > { %p559_p1 = pnand %p558_p0, %p554_p11 }
  0x2c   : > { %562 = shalt.err (!%p559_p1)
}
  0x2d   : > { %471 = dma.hbm_to_vmem [thread:$0]  (!%p748_p8), %s149_s29, 128, %s151_s7, %s138_s8  }
  0x2e   : > { %s444_s23 = sshll.u32 %s744_s22, 1  ;;  %s445_s18 = sshll.u32 %s678_s15, 1 }
  0x2f   : > { %s185_s28 = scalar_lea.hbm %s850_s2, %s445_s18  ;;  %s181_s5 = scalar_lea.vmem [#allocation9], %s444_s23 }
  0x30   : > { %s187_s4 = sshll.u32 %s185_s28, 4  ;;  %s189_s10 = sshll.u32 %s181_s5, 4  ;;  %s188_s4 = int_to_ptr.hbm [resolvable:$true] %s187_s4  ;;  %s190_s10 = int_to_ptr.vmem [resolvable:$true] %s189_s10 }
  0x31   : > { %s578_s9 = sshra.s32 %s188_s4, 4  ;;  %s585_s15 = scalar_lea.hbm %s850_s2, 4  ;;  %s579_s9 = int_to_ptr.hbm [resolvable:$true] %s578_s9 }
  0x32   : > { %s580_s30 = scalar_lea.hbm %s579_s9, 2  ;;  %p586_p6 = scmp.lt.s32.totalorder %s579_s9, %s850_s2 }
  0x33   : > { %p581_p2 = scmp.ne.s32.totalorder %s579_s9, %s580_s30  ;;  %p587_p9 = scmp.lt.s32.totalorder %s585_s15, %s580_s30 }
  0x35   : > { %p583_p3 = pnand %p581_p2, %p522_p10  ;;  %p588_p11 = por %p587_p9, %p586_p6 }
  0x37   : > { %p584_p4 = pneg %p583_p3 }
  0x39   : > { %p589_p12 = pnand %p588_p11, %p584_p4 }
  0x3b   : > { %592 = shalt.err (!%p589_p12)
}
  0x3c   : > { %477 = dma.hbm_to_vmem [thread:$0]  (!%p748_p8), %s188_s4, 32, %s190_s10, %s758_s6  }
  0x3d   : > { %198 = sbr.rel (%p776_p5) target bundleno = 271 (0x10f), region = 32  ;;  %s200_s11 = sand.u32 (!%p776_p5), 1, %s670_s13  }
  0x3e   : > { %s447_s24 = sshll.u32 (!%p776_p5), %s200_s11, 3  ;;  %s201_s12 = scalar_lea.sflag (!%p776_p5), [#allocation5], %s200_s11 }
  0x3f   : > { %s204_s23 = scalar_lea.vmem (!%p776_p5), [#allocation4], %s447_s24 }
  0x42   : > { %653 = dma.done.wait (%p739_p7), %s201_s12, 128  }
  0x43   : > { %655 = vsyncadd (%p739_p7), %s201_s12, 4294967168  ;;  %s210_s18 = sand.u32 1, %s722_s16   ;;  %s214_s26 = scalar_lea.vmem [#allocation7], %s447_s24 }
  0x44   : > { %s211_s25 = scalar_lea.sflag [#allocation8], %s210_s18 }
  0x45   : > { %657 = dma.done.wait (%p739_p7), %s211_s25, 160  }
  0x46   : > { %659 = vsyncadd (%p739_p7), %s211_s25, 4294967136  ;;  %s449_s6 = sshll.u32 %s200_s11, 1  ;;  %p450_p8 = scmp.ne.s32.totalorder %s722_s16, 0 }
  0x47   : > { %s224_s19 = scalar_lea.vmem [#allocation9], %s449_s6 }
  0x48   : > { %256 = sbr.rel (%p450_p8) target bundleno = 80 (0x50), region = 48 }
  0x4d   : > { %vm257_vm0 = vcmask 3072   ;;  %v680_v0 = vmov 0.0  }
  0x4e   : > { %258 = vst.msk [vmem:[#allocation2] sm:$0xf] %vm257_vm0, %v680_v0 }
  0x4f   : > { %259 = vst.msk [vmem:[#allocation3] sm:$0xf] %vm257_vm0, %v680_v0 }
  0x50 PF: > { %v260_v1 = vld [vmem:[%s204_s23] sm:$0xff]  ;;  %v261_v2 = vld [vmem:[%s214_s26] sm:$0xff]  ;;  %v263_v3 = vlaneseq  ;;  %vm281_vm3 = vcmask 1043456   ;;  %v681_v18 = vmov 0.0   ;;  %vm288_vm6 = vcmask 3072   ;;  %p451_p7 = scmp.ne.s32.totalorder %s722_s16, 1 }
  0x51   : > { %v270_v4 = vsub.f32 %v260_v1, %v261_v2  ;;  %v262_v6 = vld [vmem:[%s224_s19] sm:$0x3] }
  0x52   : > { %v264_v5 = vshrl.u32 %v263_v3, 7  ;;  %v266_v9 = vperm.slane %v262_v6, 0  ;;  %v267_v10 = vperm.slane %v262_v6, 1 }
  0x53   : > { %v271_v7 = vmul.f32 %v270_v4, %v270_v4 }
  0x54   : > { %v265_v8 = vadd.s32 1, %v264_v5 }
  0x55   : > { %273 = vst [vmem:[#allocation1] ss:$2 sm:$0xff] %v271_v7  ;;  %v280_v24 = vld [vmem:[#allocation2] sm:$0xf] }
  0x56   : > { %vm268_vm1 = vcmp.eq.s32.totalorder %v265_v8, %v266_v9  ;;  %vm269_vm2 = vcmp.eq.s32.totalorder %v265_v8, %v267_v10  ;;  %v290_v27 = vld [vmem:[#allocation3] sm:$0xf] }
  0x5c   : > { %v274_v11 = vld.sshfl [vmem:[#allocation1] sm:$0xff pattern:$0x75316420]  ;;  %v275_v12 = vld.sshfl [vmem:[#allocation1 + $0x8] sm:$0xff pattern:$0x75316420] }
  0x5d   : > { %v278_v13 = vsel %vm268_vm1, %v274_v11, 0.0  ;;  %v279_v14 = vsel %vm269_vm2, %v275_v12, 0.0 }
  0x5e   : > { %v282_v15 = vsel %vm281_vm3, %v278_v13, 0.0  ;;  %v283_v16 = vsel %vm281_vm3, %v279_v14, 0.0  ;;  %vm291_vm4 = vcmp.ne.f32.partialorder %v278_v13, 0.0  ;;  %vm292_vm5 = vcmp.ne.f32.partialorder %v279_v14, 0.0 }
  0x5f   : > { %v284_v17 = vadd.f32 %v283_v16, %v282_v15  ;;  %v293_v19 = vsel %vm291_vm4, 1.0, %v681_v18  ;;  %v294_v20 = vsel %vm292_vm5, 1.0, %v681_v18 }
  0x60   : > { %v295_v21 = vsel %vm281_vm3, %v293_v19, 0.0  ;;  %v296_v22 = vsel %vm281_vm3, %v294_v20, 0.0 }
  0x61   : > { %285 = vadd.xlane.f32.xlu0 %v284_v17  ;;  %v297_v23 = vadd.f32 %v296_v22, %v295_v21 }
  0x69   : > { %298 = vadd.xlane.f32.xlu0 %v297_v23 }
  0xd4   : > { %v286_v25 = vpop.xlane.xlu0 %285 }
  0xd5   : > { %v287_v26 = vadd.f32 %v286_v25, %v280_v24 }
  0xd7   : > { %289 = vst.msk [vmem:[#allocation2] sm:$0xf] %vm288_vm6, %v287_v26 }
  0xdb   : > { %305 = sbr.rel (%p451_p7) target bundleno = 266 (0x10a), region = 52 }
  0xdc   : > { %v299_v28 = vpop.xlane.xlu0 %298 }
  0xdd   : > { %v300_v29 = vadd.f32 %v299_v28, %v290_v27 }
  0xdf   : > { %301 = vst.msk [vmem:[#allocation3] sm:$0xf] %vm288_vm6, %v300_v29 }
  0xe0   : > { %v306_v40 = vld [vmem:[#allocation2] sm:$0xf]  ;;  %vm331_vm11 = vcmask 0  }
  0xe6   : > { %v307_v30 = vld [vmem:[#allocation3] sm:$0xf] }
  0xe7   : > { %v308_v31 = vadd.f32 1.0, %v307_v30 }
  0xe9   : > { %516 = vrcp.f32 %v308_v31  ;;  %v320_v34 = vand.u32 2147483648, %v308_v31  ;;  %vm314_vm7 = vweird.f32 %v308_v31  ;;  %v318_v36 = vand.u32 2147483647, %v308_v31 }
  0xeb   : > { %v321_v38 = vor.u32 1.1754944e-38, %v320_v34  ;;  %vm319_vm10 = vcmp.eq.f32.partialorder %v318_v36, 8.507059e+37 }
  0xef   : > { %v517_v32 = vpop.eup %516 }
  0xf0   : > { %v310_v33 = vmul.f32 %v517_v32, %v308_v31  ;;  %vm315_vm8 = vweird.f32 %v517_v32 }
  0xf1   : > { %vm316_vm9 = vmor %vm314_vm7, %vm315_vm8 }
  0xf2   : > { %v311_v35 = vsub.f32 1.0, %v310_v33 }
  0xf4   : > { %v312_v37 = vmul.f32 %v517_v32, %v311_v35 }
  0xf6   : > { %v313_v39 = vadd.f32 %v517_v32, %v312_v37 }
  0xf8   : > { %v317_v41 = vsel %vm316_vm9, %v517_v32, %v313_v39 }
  0xf9   : > { %v322_v42 = vsel %vm319_vm10, %v321_v38, %v317_v41 }
  0xfa   : > { %v323_v43 = vmul.f32 %v322_v42, %v306_v40 }
  0xfc   : > { %v324_v44 = vsel %vm288_vm6, %v323_v43, 0.0 }
  0xfd   : > { %v325_v45 = vrot.slane %v324_v44, 4 }
  0xff   : > { %v326_v46 = vadd.f32 %v325_v45, %v324_v44 }
 0x101   : > { %v327_v47 = vrot.slane %v326_v46, 2 }
 0x103   : > { %v328_v48 = vadd.f32 %v327_v47, %v326_v46 }
 0x105   : > { %v329_v49 = vrot.slane %v328_v48, 1 }
 0x107   : > { %v330_v50 = vadd.f32 %v329_v49, %v328_v48 }
 0x109   : > { %332 = vst.msk [vmem:[#allocation10] sm:$0x1] %vm331_vm11, %v330_v50 }
 0x10a PF: > { %p479_p10 = scmp.eq.s32.totalorder %s722_s16, 1  ;;  %s682_s21 = smov [#allocation10]  }
 0x10b   : > { %s339_s27 = sshll.u32 %s682_s21, 4  ;;  %s341_s5 = sshll.u32 %s851_s3, 4  ;;  %s340_s27 = int_to_ptr.vmem [resolvable:$true] %s339_s27  ;;  %s342_s5 = int_to_ptr.hbm [resolvable:$true] %s341_s5 }
 0x10c   : > { %465 = dma.vmem_to_hbm [thread:$0]  (%p479_p10), %s340_s27, 16, %s342_s5, [#allocation6]  }
 0x10d   : > { %661 = dma.done.wait (%p479_p10), [#allocation6], 16  }
 0x10e   : > { %663 = vsyncadd (%p479_p10), [#allocation6], 4294967280 }
 0x10f PF: > { %p17_p5 = scmp.ge.s32.totalorder %s725_s17, 4   ;;  %s855_s12 = smov %s670_s13 }
 0x110   : > { %s856_s13 = smov %s674_s14  ;;  %s857_s14 = smov %s735_s20 }
 0x111   : > { %s858_s15 = smov %s725_s17  ;;  %19 = sbr.rel (!%p17_p5) target bundleno = 6 (0x6), region = 101 }
 0x116   :  { %355 = vsyncpa [#allocation5], 1 }
 0x117   :  { %357 = vsyncpa [#allocation5 + $0x1], 1 }
 0x118   :  { %358 = vsyncpa [#allocation8], 1 }
 0x119   :  { %360 = vsyncpa [#allocation8 + $0x1], 1 }
 0x11a   :  { %361 = vsyncpa [#allocation6], 1 }
 0x11b   :  { %363 = vsyncpa [#allocation6 + $0x1], 1 }

</bundles_post_ra>
